<compile_context>
chip_gen: v6e
topology: v6e:2x2x1
jax: 0.10.0
libtpu: 0.0.40
codegen_flags: <defaults>
</compile_context>

<pallas_src>
import functools

import jax
import jax.numpy as jnp
from jax import lax
from jax.experimental import pallas as pl
from jax.experimental.pallas import tpu as pltpu


# ----------------------------- Pallas kernel -------------------------------

def _fused_cell(gates, c, H):
    """One LSTM step for BOTH encoders at once.

    gates: (Bp, 8H) in fused layout [i1,i2,f1,f2,o1,o2,g1,g2] (already includes the
    input projection, biases and -- for the forward chain -- the recurrent term).
    c: (Bp, 2H) fused cell state [c1 | c2].
    """
    C = 2 * H
    sig = jax.nn.sigmoid(gates[:, :3 * C])   # i|f|o of both LSTMs: one EUP pass
    g = jnp.tanh(gates[:, 3 * C:])           # g of both LSTMs: one EUP pass
    i = sig[:, 0:C]
    f = sig[:, C:2 * C]
    o = sig[:, 2 * C:3 * C]
    c_new = f * c + i * g
    h_new = o * jnp.tanh(c_new)
    return h_new, c_new


def encoder_kernel(T, Bp, H, Dp, x_ref, w_ref, p_ref, o_ref):
    """Fused: bi-LSTM(input)[:, -1], bi-LSTM(output)[:, -1], concat, Linear.

    x_ref: (T*Bp, Dp)  packed time-major activations (+ bias indicator columns)
    w_ref: (Dp+2H, 16H) packed weights: rows [0:Dp] = input->gates (fwd | bwd),
                         rows [Dp:Dp+2H] = fused forward W_hh (lanes [0:8H]).
    p_ref: (>=4H+1, H)  rows [0:4H] = permuted projection weight, row 4H = bias.
    o_ref: (Bp, H)
    """
    C = 2 * H            # fused carry width
    G = 8 * H            # fused gate width (forward); backward gates live at [G:2G]

    w_gates = w_ref[0:Dp, :]             # (Dp, 2G)
    w_hh = w_ref[Dp:Dp + C, 0:G]         # (C, G) block-structured recurrent weight

    # One hoisted MXU matmul covers the input->gate projection of BOTH LSTMs in BOTH
    # directions, biases included -- entirely off the serial path.
    gx_all = jnp.dot(x_ref[...], w_gates,
                     preferred_element_type=jnp.float32)        # (T*Bp, 2G)

    # Fused forward recurrence: one serial chain carries (h, c) of both LSTMs.
    # h/c live in vregs across the fully unrolled static time loop.
    # TODO(synk): W_hh is loop-invariant; pltpu.matmul_push_rhs/acc/pop could keep it
    # resident in the MXU staging registers across the unrolled steps.
    h = jnp.zeros((Bp, C), jnp.float32)
    c = jnp.zeros((Bp, C), jnp.float32)
    for t in range(T):
        gates = gx_all[t * Bp:(t + 1) * Bp, 0:G] + jnp.dot(
            h, w_hh, preferred_element_type=jnp.float32)
        h, c = _fused_cell(gates, c, H)

    # Backward direction at the last timestep == a single step from zero state, so
    # its recurrent term vanishes: the gates are exactly the hoisted backward gx rows.
    hb, _ = _fused_cell(gx_all[(T - 1) * Bp:T * Bp, G:2 * G],
                        jnp.zeros((Bp, C), jnp.float32), H)

    # (Bp, 4H) = (8, 128): lane-dense, stays in VMEM. Row permutation of the
    # projection weight was done host-side, so this multiplies directly.
    concat = jnp.concatenate([h, hb], axis=1)   # [hf_in | hf_out | hb_in | hb_out]
    o_ref[...] = (jnp.dot(concat, p_ref[0:4 * H, :],
                          preferred_element_type=jnp.float32)
                  + p_ref[4 * H:4 * H + 1, :])


# ----------------------------- host-side packing ----------------------------

def _scatter_gates(a, H, slot):
    """(..., 4H) in PyTorch gate order [i,f,g,o] -> (..., 8H) in fused order
    [i1,i2,f1,f2,o1,o2,g1,g2]; this LSTM's gates land in `slot` (0/1), rest zero."""
    i = a[..., 0 * H:1 * H]
    f = a[..., 1 * H:2 * H]
    g = a[..., 2 * H:3 * H]
    o = a[..., 3 * H:4 * H]
    z = jnp.zeros_like(i)
    blocks = [i, z, f, z, o, z, g, z] if slot == 0 else [z, i, z, f, z, o, z, g]
    return jnp.concatenate(blocks, axis=-1)


def pack_params(p_in, p_out, w_proj, b_proj, D_in, D_out, H, Dp):
    """Pack all weights into two slabs (one weight slab + one projection slab)."""
    G = 8 * H

    def gates_block(wk, bk):
        # Row layout must match the x slab's column layout:
        #   [x_in (D_in) | ind_in (1) | x_out (D_out) | ind_out (1) | zero-pad]
        w = jnp.concatenate([
            _scatter_gates(p_in[wk], H, 0),    # (D_in, 8H)
            _scatter_gates(p_in[bk], H, 0),    # (1, 8H)  bias via indicator column
            _scatter_gates(p_out[wk], H, 1),   # (D_out, 8H)
            _scatter_gates(p_out[bk], H, 1),   # (1, 8H)
        ], axis=0)
        return jnp.pad(w, ((0, Dp - w.shape[0]), (0, 0)))        # (Dp, 8H)

    w_gates = jnp.concatenate([gates_block("wih_f", "b_f"),      # forward gates
                               gates_block("wih_b", "b_b")],     # backward gates
                              axis=1)                            # (Dp, 16H)

    # Block-structured fused recurrent weight (forward only; backward needs none).
    w_hh = jnp.concatenate([_scatter_gates(p_in["whh_f"], H, 0),
                            _scatter_gates(p_out["whh_f"], H, 1)], axis=0)  # (2H, 8H)
    w_hh = jnp.pad(w_hh, ((0, 0), (0, G)))                       # lane-pad to 16H

    w_slab = jnp.concatenate([w_gates, w_hh], axis=0)            # (Dp + 2H, 16H)

    # Projection: permute rows so the kernel concat [hf_in,hf_out,hb_in,hb_out]
    # matches PyTorch's [hf_in,hb_in,hf_out,hb_out]; append bias as the last row.
    perm = jnp.concatenate([jnp.arange(0, H), jnp.arange(2 * H, 3 * H),
                            jnp.arange(H, 2 * H), jnp.arange(3 * H, 4 * H)])
    p_slab = jnp.concatenate([w_proj[perm, :], b_proj], axis=0)  # (4H+1, H)
    p_slab = jnp.pad(p_slab, ((0, (-p_slab.shape[0]) % 8), (0, 0)))
    return w_slab, p_slab


def _prep_inputs(input_seq, output_seq, Bp, T, Dp):
    """Time-major, batch padded to Bp, both sequences front-padded to T steps, bias
    indicator columns appended, flattened to one (T*Bp, Dp) slab."""
    B, T_in, _ = input_seq.shape
    _, T_out, _ = output_seq.shape
    f32 = jnp.float32
    x_in = jnp.transpose(input_seq, (1, 0, 2)).astype(f32)      # (T_in, B, D_in)
    x_out = jnp.transpose(output_seq, (1, 0, 2)).astype(f32)    # (T_out, B, D_out)
    x_in = jnp.pad(x_in, ((T - T_in, 0), (0, Bp - B), (0, 0)))
    x_out = jnp.pad(x_out, ((T - T_out, 0), (0, Bp - B), (0, 0)))
    t = jnp.arange(T)[:, None, None]
    ind_in = jnp.broadcast_to((t >= T - T_in).astype(f32), (T, Bp, 1))
    ind_out = jnp.broadcast_to((t >= T - T_out).astype(f32), (T, Bp, 1))
    x = jnp.concatenate([x_in, ind_in, x_out, ind_out], axis=-1)
    x = jnp.pad(x, ((0, 0), (0, 0), (0, Dp - x.shape[-1])))
    return x.reshape(T * Bp, Dp)


# ----------------------------- wrapper --------------------------------------

_VMEM = pl.BlockSpec(memory_space=pltpu.MemorySpace.VMEM)


def test_case_encoder_forward(input_seq, output_seq, p_in, p_out, w_proj, b_proj):
    """input_seq: (B, T_in, input_size); output_seq: (B, T_out, output_size).

    p_in / p_out are raw (PyTorch gate order) bi-LSTM params from init_bilstm.
    Returns (B, H)."""
    B, T_in, D_in = input_seq.shape
    _, T_out, D_out = output_seq.shape
    H = p_in["whh_f"].shape[0]
    T = max(T_in, T_out)
    Bp = max(8, ((B + 7) // 8) * 8)                  # pad batch to the f32 sublane tile
    Dp = ((D_in + D_out + 2 + 7) // 8) * 8           # packed feature width (8-aligned)

    x_slab = _prep_inputs(input_seq, output_seq, Bp, T, Dp)          # (T*Bp, Dp)
    w_slab, p_slab = pack_params(p_in, p_out, w_proj, b_proj,
                                 D_in, D_out, H, Dp)                  # (Dp+2H,16H),(*,H)

    kernel = functools.partial(encoder_kernel, T, Bp, H, Dp)
    out = pl.pallas_call(
        kernel,
        out_shape=jax.ShapeDtypeStruct((Bp, H), jnp.float32),
        in_specs=[_VMEM] * 3,
        out_specs=_VMEM,
    )(x_slab, w_slab, p_slab)
    return out[:B]                                   # drop padded batch rows


# ----------------------------- parameter init -------------------------------

def init_bilstm(key, input_size, hidden_size):
    """PyTorch-style U(-1/sqrt(H), 1/sqrt(H)); biases b_ih + b_hh pre-summed.
    Gate order along the 4H axis is PyTorch's [i, f, g, o]."""
    H = hidden_size
    k = 1.0 / jnp.sqrt(jnp.float32(H))
    keys = jax.random.split(key, 10)
    u = lambda kk, shape: jax.random.uniform(kk, shape, jnp.float32, -k, k)
    return dict(
        wih_f=u(keys[0], (input_size, 4 * H)),
        whh_f=u(keys[1], (H, 4 * H)),
        b_f=(u(keys[2], (1, 4 * H)) + u(keys[3], (1, 4 * H))),
        wih_b=u(keys[4], (input_size, 4 * H)),
        whh_b=u(keys[5], (H, 4 * H)),    # unused by the kernel (zero-state bwd step)
        b_b=(u(keys[6], (1, 4 * H)) + u(keys[7], (1, 4 * H))),
    )


# ----------------------------- pure-JAX reference ----------------------------

def _ref_scan_dir(x_tbd, wih, whh, b, H):
    B = x_tbd.shape[1]

    def cell(carry, x_t):
        h, c = carry
        gates = x_t @ wih + h @ whh + b[0]
        i = jax.nn.sigmoid(gates[:, :H])
        f = jax.nn.sigmoid(gates[:, H:2 * H])
        g = jnp.tanh(gates[:, 2 * H:3 * H])
        o = jax.nn.sigmoid(gates[:, 3 * H:])
        c = f * c + i * g
        h = o * jnp.tanh(c)
        return (h, c), h

    init = (jnp.zeros((B, H), jnp.float32), jnp.zeros((B, H), jnp.float32))
    _, hs = lax.scan(cell, init, x_tbd)
    return hs  # (T, B, H)


def bilstm_last_ref(x_btd, p):
    """Full bidirectional LSTM (PyTorch semantics), then take [:, -1, :]."""
    H = p["whh_f"].shape[0]
    x_tbd = jnp.transpose(x_btd, (1, 0, 2))
    hs_f = _ref_scan_dir(x_tbd, p["wih_f"], p["whh_f"], p["b_f"], H)
    hs_b = _ref_scan_dir(x_tbd[::-1], p["wih_b"], p["whh_b"], p["b_b"], H)[::-1]
    out = jnp.concatenate([hs_f, hs_b], axis=-1)  # (T, B, 2H)
    return out[-1]                                # (B, 2H)


# ----------------------------- main -----------------------------------------

if __name__ == "__main__":
    B, T_in, T_out = 2, 8, 6
    input_size, output_size, hidden_size = 16, 12, 32

    key = jax.random.PRNGKey(0)
    k_x, k_y, k_pin, k_pout, k_w, k_b = jax.random.split(key, 6)

    input_seq = jax.random.normal(k_x, (B, T_in, input_size), jnp.float32)
    output_seq = jax.random.normal(k_y, (B, T_out, output_size), jnp.float32)

    p_in = init_bilstm(k_pin, input_size, hidden_size)
    p_out = init_bilstm(k_pout, output_size, hidden_size)

    kproj = 1.0 / jnp.sqrt(jnp.float32(4 * hidden_size))
    w_proj = jax.random.uniform(k_w, (4 * hidden_size, hidden_size),
                                jnp.float32, -kproj, kproj)
    b_proj = jax.random.uniform(k_b, (1, hidden_size), jnp.float32, -kproj, kproj)

    result = test_case_encoder_forward(input_seq, output_seq,
                                       p_in, p_out, w_proj, b_proj)
    result = jax.block_until_ready(result)
    assert result.shape == (B, hidden_size)

    # Pure-JAX reference check (PyTorch gate order, raw params).
    ref_concat = jnp.concatenate(
        [bilstm_last_ref(input_seq, p_in), bilstm_last_ref(output_seq, p_out)],
        axis=1)
    ref = ref_concat @ w_proj + b_proj
    assert jnp.allclose(result, ref, rtol=1e-4, atol=1e-4), (
        float(jnp.max(jnp.abs(result - ref))))

    print("KERNEL_OK")
</pallas_src>

<mosaic_0001>
module attributes {stable_mosaic.version = 11 : i64} {
  func.func @encoder_kernel(%arg0: memref<64x32xf32, #tpu.memory_space<vmem>>, %arg1: memref<96x512xf32, #tpu.memory_space<vmem>>, %arg2: memref<136x32xf32, #tpu.memory_space<vmem>>, %arg3: memref<8x32xf32, #tpu.memory_space<vmem>>) attributes {dimension_semantics = [], scalar_prefetch = 0 : i64, scratch_operands = 0 : i64, tpu.core_type = #tpu.core_type<tc>} {
    %c0 = arith.constant 0 : index
    %c0_0 = arith.constant 0 : index
    %0 = vector.load %arg1[%c0, %c0_0] : memref<96x512xf32, #tpu.memory_space<vmem>>, vector<32x512xf32>
    %c32 = arith.constant 32 : index
    %c0_1 = arith.constant 0 : index
    %1 = vector.load %arg1[%c32, %c0_1] : memref<96x512xf32, #tpu.memory_space<vmem>>, vector<64x256xf32>
    %c0_2 = arith.constant 0 : index
    %c0_3 = arith.constant 0 : index
    %2 = vector.load %arg0[%c0_2, %c0_3] : memref<64x32xf32, #tpu.memory_space<vmem>>, vector<64x32xf32>
    %cst = arith.constant dense<0.000000e+00> : vector<64x512xf32>
    %3 = tpu.matmul %2, %0, %cst {dimension_numbers = #tpu.dot_dimension_numbers<[1], [0], [0], [1], [0, 0, 1, 1], [], []>} : vector<64x32xf32>, vector<32x512xf32>, vector<64x512xf32> -> vector<64x512xf32>
    %cst_4 = arith.constant 0.000000e+00 : f32
    %4 = vector.broadcast %cst_4 : f32 to vector<8x64xf32>
    %cst_5 = arith.constant 0.000000e+00 : f32
    %5 = vector.broadcast %cst_5 : f32 to vector<8x64xf32>
    %6 = vector.extract_strided_slice %3 {offsets = [0, 0], sizes = [8, 256], strides = [1, 1]} : vector<64x512xf32> to vector<8x256xf32>
    %cst_6 = arith.constant dense<0.000000e+00> : vector<8x256xf32>
    %7 = tpu.matmul %4, %1, %cst_6 {dimension_numbers = #tpu.dot_dimension_numbers<[1], [0], [0], [1], [0, 0, 1, 1], [], []>} : vector<8x64xf32>, vector<64x256xf32>, vector<8x256xf32> -> vector<8x256xf32>
    %8 = arith.addf %6, %7 : vector<8x256xf32>
    %9 = vector.extract_strided_slice %8 {offsets = [0, 0], sizes = [8, 192], strides = [1, 1]} : vector<8x256xf32> to vector<8x192xf32>
    %10 = arith.negf %9 : vector<8x192xf32>
    %11 = math.exp %10 : vector<8x192xf32>
    %cst_7 = arith.constant 1.000000e+00 : f32
    %12 = vector.broadcast %cst_7 : f32 to vector<8x192xf32>
    %13 = arith.addf %12, %11 : vector<8x192xf32>
    %14 = arith.divf %12, %13 : vector<8x192xf32>
    %15 = vector.extract_strided_slice %8 {offsets = [0, 192], sizes = [8, 64], strides = [1, 1]} : vector<8x256xf32> to vector<8x64xf32>
    %16 = math.tanh %15 : vector<8x64xf32>
    %17 = vector.extract_strided_slice %14 {offsets = [0, 0], sizes = [8, 64], strides = [1, 1]} : vector<8x192xf32> to vector<8x64xf32>
    %18 = vector.extract_strided_slice %14 {offsets = [0, 64], sizes = [8, 64], strides = [1, 1]} : vector<8x192xf32> to vector<8x64xf32>
    %19 = vector.extract_strided_slice %14 {offsets = [0, 128], sizes = [8, 64], strides = [1, 1]} : vector<8x192xf32> to vector<8x64xf32>
    %20 = arith.mulf %18, %5 : vector<8x64xf32>
    %21 = arith.mulf %17, %16 : vector<8x64xf32>
    %22 = arith.addf %20, %21 : vector<8x64xf32>
    %23 = math.tanh %22 : vector<8x64xf32>
    %24 = arith.mulf %19, %23 : vector<8x64xf32>
    %25 = vector.extract_strided_slice %3 {offsets = [8, 0], sizes = [8, 256], strides = [1, 1]} : vector<64x512xf32> to vector<8x256xf32>
    %cst_8 = arith.constant dense<0.000000e+00> : vector<8x256xf32>
    %26 = tpu.matmul %24, %1, %cst_8 {dimension_numbers = #tpu.dot_dimension_numbers<[1], [0], [0], [1], [0, 0, 1, 1], [], []>} : vector<8x64xf32>, vector<64x256xf32>, vector<8x256xf32> -> vector<8x256xf32>
    %27 = arith.addf %25, %26 : vector<8x256xf32>
    %28 = vector.extract_strided_slice %27 {offsets = [0, 0], sizes = [8, 192], strides = [1, 1]} : vector<8x256xf32> to vector<8x192xf32>
    %29 = arith.negf %28 : vector<8x192xf32>
    %30 = math.exp %29 : vector<8x192xf32>
    %cst_9 = arith.constant 1.000000e+00 : f32
    %31 = vector.broadcast %cst_9 : f32 to vector<8x192xf32>
    %32 = arith.addf %31, %30 : vector<8x192xf32>
    %33 = arith.divf %31, %32 : vector<8x192xf32>
    %34 = vector.extract_strided_slice %27 {offsets = [0, 192], sizes = [8, 64], strides = [1, 1]} : vector<8x256xf32> to vector<8x64xf32>
    %35 = math.tanh %34 : vector<8x64xf32>
    %36 = vector.extract_strided_slice %33 {offsets = [0, 0], sizes = [8, 64], strides = [1, 1]} : vector<8x192xf32> to vector<8x64xf32>
    %37 = vector.extract_strided_slice %33 {offsets = [0, 64], sizes = [8, 64], strides = [1, 1]} : vector<8x192xf32> to vector<8x64xf32>
    %38 = vector.extract_strided_slice %33 {offsets = [0, 128], sizes = [8, 64], strides = [1, 1]} : vector<8x192xf32> to vector<8x64xf32>
    %39 = arith.mulf %37, %22 : vector<8x64xf32>
    %40 = arith.mulf %36, %35 : vector<8x64xf32>
    %41 = arith.addf %39, %40 : vector<8x64xf32>
    %42 = math.tanh %41 : vector<8x64xf32>
    %43 = arith.mulf %38, %42 : vector<8x64xf32>
    %44 = vector.extract_strided_slice %3 {offsets = [16, 0], sizes = [8, 256], strides = [1, 1]} : vector<64x512xf32> to vector<8x256xf32>
    %cst_10 = arith.constant dense<0.000000e+00> : vector<8x256xf32>
    %45 = tpu.matmul %43, %1, %cst_10 {dimension_numbers = #tpu.dot_dimension_numbers<[1], [0], [0], [1], [0, 0, 1, 1], [], []>} : vector<8x64xf32>, vector<64x256xf32>, vector<8x256xf32> -> vector<8x256xf32>
    %46 = arith.addf %44, %45 : vector<8x256xf32>
    %47 = vector.extract_strided_slice %46 {offsets = [0, 0], sizes = [8, 192], strides = [1, 1]} : vector<8x256xf32> to vector<8x192xf32>
    %48 = arith.negf %47 : vector<8x192xf32>
    %49 = math.exp %48 : vector<8x192xf32>
    %cst_11 = arith.constant 1.000000e+00 : f32
    %50 = vector.broadcast %cst_11 : f32 to vector<8x192xf32>
    %51 = arith.addf %50, %49 : vector<8x192xf32>
    %52 = arith.divf %50, %51 : vector<8x192xf32>
    %53 = vector.extract_strided_slice %46 {offsets = [0, 192], sizes = [8, 64], strides = [1, 1]} : vector<8x256xf32> to vector<8x64xf32>
    %54 = math.tanh %53 : vector<8x64xf32>
    %55 = vector.extract_strided_slice %52 {offsets = [0, 0], sizes = [8, 64], strides = [1, 1]} : vector<8x192xf32> to vector<8x64xf32>
    %56 = vector.extract_strided_slice %52 {offsets = [0, 64], sizes = [8, 64], strides = [1, 1]} : vector<8x192xf32> to vector<8x64xf32>
    %57 = vector.extract_strided_slice %52 {offsets = [0, 128], sizes = [8, 64], strides = [1, 1]} : vector<8x192xf32> to vector<8x64xf32>
    %58 = arith.mulf %56, %41 : vector<8x64xf32>
    %59 = arith.mulf %55, %54 : vector<8x64xf32>
    %60 = arith.addf %58, %59 : vector<8x64xf32>
    %61 = math.tanh %60 : vector<8x64xf32>
    %62 = arith.mulf %57, %61 : vector<8x64xf32>
    %63 = vector.extract_strided_slice %3 {offsets = [24, 0], sizes = [8, 256], strides = [1, 1]} : vector<64x512xf32> to vector<8x256xf32>
    %cst_12 = arith.constant dense<0.000000e+00> : vector<8x256xf32>
    %64 = tpu.matmul %62, %1, %cst_12 {dimension_numbers = #tpu.dot_dimension_numbers<[1], [0], [0], [1], [0, 0, 1, 1], [], []>} : vector<8x64xf32>, vector<64x256xf32>, vector<8x256xf32> -> vector<8x256xf32>
    %65 = arith.addf %63, %64 : vector<8x256xf32>
    %66 = vector.extract_strided_slice %65 {offsets = [0, 0], sizes = [8, 192], strides = [1, 1]} : vector<8x256xf32> to vector<8x192xf32>
    %67 = arith.negf %66 : vector<8x192xf32>
    %68 = math.exp %67 : vector<8x192xf32>
    %cst_13 = arith.constant 1.000000e+00 : f32
    %69 = vector.broadcast %cst_13 : f32 to vector<8x192xf32>
    %70 = arith.addf %69, %68 : vector<8x192xf32>
    %71 = arith.divf %69, %70 : vector<8x192xf32>
    %72 = vector.extract_strided_slice %65 {offsets = [0, 192], sizes = [8, 64], strides = [1, 1]} : vector<8x256xf32> to vector<8x64xf32>
    %73 = math.tanh %72 : vector<8x64xf32>
    %74 = vector.extract_strided_slice %71 {offsets = [0, 0], sizes = [8, 64], strides = [1, 1]} : vector<8x192xf32> to vector<8x64xf32>
    %75 = vector.extract_strided_slice %71 {offsets = [0, 64], sizes = [8, 64], strides = [1, 1]} : vector<8x192xf32> to vector<8x64xf32>
    %76 = vector.extract_strided_slice %71 {offsets = [0, 128], sizes = [8, 64], strides = [1, 1]} : vector<8x192xf32> to vector<8x64xf32>
    %77 = arith.mulf %75, %60 : vector<8x64xf32>
    %78 = arith.mulf %74, %73 : vector<8x64xf32>
    %79 = arith.addf %77, %78 : vector<8x64xf32>
    %80 = math.tanh %79 : vector<8x64xf32>
    %81 = arith.mulf %76, %80 : vector<8x64xf32>
    %82 = vector.extract_strided_slice %3 {offsets = [32, 0], sizes = [8, 256], strides = [1, 1]} : vector<64x512xf32> to vector<8x256xf32>
    %cst_14 = arith.constant dense<0.000000e+00> : vector<8x256xf32>
    %83 = tpu.matmul %81, %1, %cst_14 {dimension_numbers = #tpu.dot_dimension_numbers<[1], [0], [0], [1], [0, 0, 1, 1], [], []>} : vector<8x64xf32>, vector<64x256xf32>, vector<8x256xf32> -> vector<8x256xf32>
    %84 = arith.addf %82, %83 : vector<8x256xf32>
    %85 = vector.extract_strided_slice %84 {offsets = [0, 0], sizes = [8, 192], strides = [1, 1]} : vector<8x256xf32> to vector<8x192xf32>
    %86 = arith.negf %85 : vector<8x192xf32>
    %87 = math.exp %86 : vector<8x192xf32>
    %cst_15 = arith.constant 1.000000e+00 : f32
    %88 = vector.broadcast %cst_15 : f32 to vector<8x192xf32>
    %89 = arith.addf %88, %87 : vector<8x192xf32>
    %90 = arith.divf %88, %89 : vector<8x192xf32>
    %91 = vector.extract_strided_slice %84 {offsets = [0, 192], sizes = [8, 64], strides = [1, 1]} : vector<8x256xf32> to vector<8x64xf32>
    %92 = math.tanh %91 : vector<8x64xf32>
    %93 = vector.extract_strided_slice %90 {offsets = [0, 0], sizes = [8, 64], strides = [1, 1]} : vector<8x192xf32> to vector<8x64xf32>
    %94 = vector.extract_strided_slice %90 {offsets = [0, 64], sizes = [8, 64], strides = [1, 1]} : vector<8x192xf32> to vector<8x64xf32>
    %95 = vector.extract_strided_slice %90 {offsets = [0, 128], sizes = [8, 64], strides = [1, 1]} : vector<8x192xf32> to vector<8x64xf32>
    %96 = arith.mulf %94, %79 : vector<8x64xf32>
    %97 = arith.mulf %93, %92 : vector<8x64xf32>
    %98 = arith.addf %96, %97 : vector<8x64xf32>
    %99 = math.tanh %98 : vector<8x64xf32>
    %100 = arith.mulf %95, %99 : vector<8x64xf32>
    %101 = vector.extract_strided_slice %3 {offsets = [40, 0], sizes = [8, 256], strides = [1, 1]} : vector<64x512xf32> to vector<8x256xf32>
    %cst_16 = arith.constant dense<0.000000e+00> : vector<8x256xf32>
    %102 = tpu.matmul %100, %1, %cst_16 {dimension_numbers = #tpu.dot_dimension_numbers<[1], [0], [0], [1], [0, 0, 1, 1], [], []>} : vector<8x64xf32>, vector<64x256xf32>, vector<8x256xf32> -> vector<8x256xf32>
    %103 = arith.addf %101, %102 : vector<8x256xf32>
    %104 = vector.extract_strided_slice %103 {offsets = [0, 0], sizes = [8, 192], strides = [1, 1]} : vector<8x256xf32> to vector<8x192xf32>
    %105 = arith.negf %104 : vector<8x192xf32>
    %106 = math.exp %105 : vector<8x192xf32>
    %cst_17 = arith.constant 1.000000e+00 : f32
    %107 = vector.broadcast %cst_17 : f32 to vector<8x192xf32>
    %108 = arith.addf %107, %106 : vector<8x192xf32>
    %109 = arith.divf %107, %108 : vector<8x192xf32>
    %110 = vector.extract_strided_slice %103 {offsets = [0, 192], sizes = [8, 64], strides = [1, 1]} : vector<8x256xf32> to vector<8x64xf32>
    %111 = math.tanh %110 : vector<8x64xf32>
    %112 = vector.extract_strided_slice %109 {offsets = [0, 0], sizes = [8, 64], strides = [1, 1]} : vector<8x192xf32> to vector<8x64xf32>
    %113 = vector.extract_strided_slice %109 {offsets = [0, 64], sizes = [8, 64], strides = [1, 1]} : vector<8x192xf32> to vector<8x64xf32>
    %114 = vector.extract_strided_slice %109 {offsets = [0, 128], sizes = [8, 64], strides = [1, 1]} : vector<8x192xf32> to vector<8x64xf32>
    %115 = arith.mulf %113, %98 : vector<8x64xf32>
    %116 = arith.mulf %112, %111 : vector<8x64xf32>
    %117 = arith.addf %115, %116 : vector<8x64xf32>
    %118 = math.tanh %117 : vector<8x64xf32>
    %119 = arith.mulf %114, %118 : vector<8x64xf32>
    %120 = vector.extract_strided_slice %3 {offsets = [48, 0], sizes = [8, 256], strides = [1, 1]} : vector<64x512xf32> to vector<8x256xf32>
    %cst_18 = arith.constant dense<0.000000e+00> : vector<8x256xf32>
    %121 = tpu.matmul %119, %1, %cst_18 {dimension_numbers = #tpu.dot_dimension_numbers<[1], [0], [0], [1], [0, 0, 1, 1], [], []>} : vector<8x64xf32>, vector<64x256xf32>, vector<8x256xf32> -> vector<8x256xf32>
    %122 = arith.addf %120, %121 : vector<8x256xf32>
    %123 = vector.extract_strided_slice %122 {offsets = [0, 0], sizes = [8, 192], strides = [1, 1]} : vector<8x256xf32> to vector<8x192xf32>
    %124 = arith.negf %123 : vector<8x192xf32>
    %125 = math.exp %124 : vector<8x192xf32>
    %cst_19 = arith.constant 1.000000e+00 : f32
    %126 = vector.broadcast %cst_19 : f32 to vector<8x192xf32>
    %127 = arith.addf %126, %125 : vector<8x192xf32>
    %128 = arith.divf %126, %127 : vector<8x192xf32>
    %129 = vector.extract_strided_slice %122 {offsets = [0, 192], sizes = [8, 64], strides = [1, 1]} : vector<8x256xf32> to vector<8x64xf32>
    %130 = math.tanh %129 : vector<8x64xf32>
    %131 = vector.extract_strided_slice %128 {offsets = [0, 0], sizes = [8, 64], strides = [1, 1]} : vector<8x192xf32> to vector<8x64xf32>
    %132 = vector.extract_strided_slice %128 {offsets = [0, 64], sizes = [8, 64], strides = [1, 1]} : vector<8x192xf32> to vector<8x64xf32>
    %133 = vector.extract_strided_slice %128 {offsets = [0, 128], sizes = [8, 64], strides = [1, 1]} : vector<8x192xf32> to vector<8x64xf32>
    %134 = arith.mulf %132, %117 : vector<8x64xf32>
    %135 = arith.mulf %131, %130 : vector<8x64xf32>
    %136 = arith.addf %134, %135 : vector<8x64xf32>
    %137 = math.tanh %136 : vector<8x64xf32>
    %138 = arith.mulf %133, %137 : vector<8x64xf32>
    %139 = vector.extract_strided_slice %3 {offsets = [56, 0], sizes = [8, 256], strides = [1, 1]} : vector<64x512xf32> to vector<8x256xf32>
    %cst_20 = arith.constant dense<0.000000e+00> : vector<8x256xf32>
    %140 = tpu.matmul %138, %1, %cst_20 {dimension_numbers = #tpu.dot_dimension_numbers<[1], [0], [0], [1], [0, 0, 1, 1], [], []>} : vector<8x64xf32>, vector<64x256xf32>, vector<8x256xf32> -> vector<8x256xf32>
    %141 = arith.addf %139, %140 : vector<8x256xf32>
    %142 = vector.extract_strided_slice %141 {offsets = [0, 0], sizes = [8, 192], strides = [1, 1]} : vector<8x256xf32> to vector<8x192xf32>
    %143 = arith.negf %142 : vector<8x192xf32>
    %144 = math.exp %143 : vector<8x192xf32>
    %cst_21 = arith.constant 1.000000e+00 : f32
    %145 = vector.broadcast %cst_21 : f32 to vector<8x192xf32>
    %146 = arith.addf %145, %144 : vector<8x192xf32>
    %147 = arith.divf %145, %146 : vector<8x192xf32>
    %148 = vector.extract_strided_slice %141 {offsets = [0, 192], sizes = [8, 64], strides = [1, 1]} : vector<8x256xf32> to vector<8x64xf32>
    %149 = math.tanh %148 : vector<8x64xf32>
    %150 = vector.extract_strided_slice %147 {offsets = [0, 0], sizes = [8, 64], strides = [1, 1]} : vector<8x192xf32> to vector<8x64xf32>
    %151 = vector.extract_strided_slice %147 {offsets = [0, 64], sizes = [8, 64], strides = [1, 1]} : vector<8x192xf32> to vector<8x64xf32>
    %152 = vector.extract_strided_slice %147 {offsets = [0, 128], sizes = [8, 64], strides = [1, 1]} : vector<8x192xf32> to vector<8x64xf32>
    %153 = arith.mulf %151, %136 : vector<8x64xf32>
    %154 = arith.mulf %150, %149 : vector<8x64xf32>
    %155 = arith.addf %153, %154 : vector<8x64xf32>
    %156 = math.tanh %155 : vector<8x64xf32>
    %157 = arith.mulf %152, %156 : vector<8x64xf32>
    %158 = vector.extract_strided_slice %3 {offsets = [56, 256], sizes = [8, 256], strides = [1, 1]} : vector<64x512xf32> to vector<8x256xf32>
    %cst_22 = arith.constant 0.000000e+00 : f32
    %159 = vector.broadcast %cst_22 : f32 to vector<8x64xf32>
    %160 = vector.extract_strided_slice %158 {offsets = [0, 0], sizes = [8, 192], strides = [1, 1]} : vector<8x256xf32> to vector<8x192xf32>
    %161 = arith.negf %160 : vector<8x192xf32>
    %162 = math.exp %161 : vector<8x192xf32>
    %cst_23 = arith.constant 1.000000e+00 : f32
    %163 = vector.broadcast %cst_23 : f32 to vector<8x192xf32>
    %164 = arith.addf %163, %162 : vector<8x192xf32>
    %165 = arith.divf %163, %164 : vector<8x192xf32>
    %166 = vector.extract_strided_slice %158 {offsets = [0, 192], sizes = [8, 64], strides = [1, 1]} : vector<8x256xf32> to vector<8x64xf32>
    %167 = math.tanh %166 : vector<8x64xf32>
    %168 = vector.extract_strided_slice %165 {offsets = [0, 0], sizes = [8, 64], strides = [1, 1]} : vector<8x192xf32> to vector<8x64xf32>
    %169 = vector.extract_strided_slice %165 {offsets = [0, 64], sizes = [8, 64], strides = [1, 1]} : vector<8x192xf32> to vector<8x64xf32>
    %170 = vector.extract_strided_slice %165 {offsets = [0, 128], sizes = [8, 64], strides = [1, 1]} : vector<8x192xf32> to vector<8x64xf32>
    %171 = arith.mulf %169, %159 : vector<8x64xf32>
    %172 = arith.mulf %168, %167 : vector<8x64xf32>
    %173 = arith.addf %171, %172 : vector<8x64xf32>
    %174 = math.tanh %173 : vector<8x64xf32>
    %175 = arith.mulf %170, %174 : vector<8x64xf32>
    %176 = tpu.concatenate %157, %175 in 1 : vector<8x64xf32>, vector<8x64xf32> -> vector<8x128xf32>
    %c0_24 = arith.constant 0 : index
    %c0_25 = arith.constant 0 : index
    %177 = vector.load %arg2[%c0_24, %c0_25] : memref<136x32xf32, #tpu.memory_space<vmem>>, vector<128x32xf32>
    %cst_26 = arith.constant dense<0.000000e+00> : vector<8x32xf32>
    %178 = tpu.matmul %176, %177, %cst_26 {dimension_numbers = #tpu.dot_dimension_numbers<[1], [0], [0], [1], [0, 0, 1, 1], [], []>} : vector<8x128xf32>, vector<128x32xf32>, vector<8x32xf32> -> vector<8x32xf32>
    %c128 = arith.constant 128 : index
    %c0_27 = arith.constant 0 : index
    %179 = vector.load %arg2[%c128, %c0_27] : memref<136x32xf32, #tpu.memory_space<vmem>>, vector<1x32xf32>
    %180 = vector.broadcast %179 : vector<1x32xf32> to vector<8x32xf32>
    %181 = arith.addf %178, %180 : vector<8x32xf32>
    %c0_28 = arith.constant 0 : index
    %c0_29 = arith.constant 0 : index
    %182 = vector.load %arg3[%c0_28, %c0_29] : memref<8x32xf32, #tpu.memory_space<vmem>>, vector<8x32xf32>
    tpu.vector_store %arg3[%c0_28, %c0_29], %181 {strides = array<i32>} : memref<8x32xf32, #tpu.memory_space<vmem>>, vector<8x32xf32>,
    return
  }
}

</mosaic_0001>

<bundles_post_ra>
// kernel: tpu_custom_call.1
= control target key start
LH: loop header
LB: loop body
LE: loop exit
PB: predicated region body
PF: predicated region fallthrough
CT: control target
= control target key end

     0   :  { %8 = vsyncpa [#allocation3], 0  ;;  %s2006_s0 = inlined_call_operand.vmem [shape: f32[64,32], index: 0, kind: input, shape index: {}]   ;;  %s2007_s1 = inlined_call_operand.hbm [shape: f32[96,512], index: 1, kind: input, shape index: {}]   ;;  %s2008_s2 = inlined_call_operand.vmem [shape: f32[136,32], index: 2, kind: input, shape index: {}]   ;;  %s2009_s3 = inlined_call_operand.hbm [shape: f32[8,32], index: 3, kind: output, shape index: {}]  }
   0x1   :  { %9 = vsyncpa [#allocation4], 0  ;;  %s1558_s12 = smov [#allocation2]  }
   0x2   :  { %s17_s13 = sshll.u32 %s1558_s12, 4  ;;  %s18_s13 = int_to_ptr.vmem [resolvable:$true] %s17_s13 }
   0x3   :  { %s1522_s14 = scalar_lea.vmem %s18_s13, 6144  ;;  %p1527_p1 = scmp.lt.s32.totalorder %s18_s13, %s18_s13 }
   0x4   :  { %p1523_p0 = scmp.ne.s32.totalorder %s18_s13, %s1522_s14  ;;  %p1528_p2 = scmp.lt.s32.totalorder %s1522_s14, %s1522_s14 }
   0x6   :  { %p1529_p3 = por %p1528_p2, %p1527_p1 }
   0x8   :  { %p1530_p4 = pnand %p1529_p3, %p1523_p0 }
   0xa   :  { %1533 = shalt.err (!%p1530_p4)
}
   0xb   :  { %s1559_s15 = smov 512   ;;  %s1560_s16 = smov 32  }
   0xc   :  { %23 = dma.hbm_to_vmem [thread:$0]  %s2007_s1, 6144, %s18_s13, [#allocation3], %s1559_s15, %s1559_s15, %s1560_s16  }
   0xd   :  { %1554 = dma.done.wait [#allocation3], 6144  }
   0xe   :  { %1555 = vsyncadd [#allocation3], 4294961152  ;;  %v1561_v0 = vmov 0.0   ;;  %v42_v1 = vld [vmem:[#allocation2 + $0x68] sm:$0xff]  ;;  %v41_v2 = vld [vmem:[#allocation2 + $0x60] sm:$0xff]  ;;  %vm69_vm0 = vcmask 261120  }
   0xf   :  { %158 = vmatprep.mubr.f32.mxu0 %v1561_v0  ;;  %182 = vmatprep.mubr.f32.mxu1 %v1561_v0  ;;  %v38_v3 = vld [vmem:[#allocation2 + $0x48] sm:$0xff]  ;;  %v37_v4 = vld [vmem:[#allocation2 + $0x40] sm:$0xff]  ;;  %v1631_v19 = vld [vmem:[%s2006_s0 + $0x10] sm:$0xff]  ;;  %s1562_s26 = smov 64   ;;  %vm306_vm1 = vcmask 523264   ;;  %vm1563_vm2 = vmmov 0  }
  0x10   :  { %118 = vmatprep.subr.mxu0 %v42_v1  ;;  %1391 = vmatprep.subr.mxu1 %v42_v1  ;;  %v34_v5 = vld [vmem:[#allocation2 + $0x28] sm:$0xff]  ;;  %v33_v6 = vld [vmem:[#allocation2 + $0x20] sm:$0xff]  ;;  %v1651_v24 = vld [vmem:[%s2006_s0 + $0x18] sm:$0xff]  ;;  %s1564_s13 = smov [#allocation5]  }
  0x11   :  { %119 = vmatpush1.msra.mxu0 %v41_v2  ;;  %1395 = vmatpush1.msra.mxu1 %v41_v2  ;;  %v30_v7 = vld [vmem:[#allocation2 + $0x8] sm:$0xff]  ;;  %v29_v8 = vld [vmem:[#allocation2] sm:$0xff]  ;;  %v44_v49 = vld [vmem:[#allocation2 + $0x78] sm:$0xff]  ;;  %s1288_s14 = sshll.u32 %s1564_s13, 4  ;;  %s1289_s14 = int_to_ptr.vmem [resolvable:$true] %s1288_s14 }
  0x12   :  { %120 = vmatprep.subr.mxu0 %v38_v3  ;;  %1392 = vmatprep.subr.mxu1 %v38_v3  ;;  %v1593_v9 = vld [vmem:[%s2006_s0] sm:$0xff]  ;;  %v1595_v10 = vld [vmem:[#allocation2 + $0x168] sm:$0xff]  ;;  %v43_v50 = vld [vmem:[#allocation2 + $0x70] sm:$0xff]  ;;  %p1539_p6 = scmp.lt.s32.totalorder %s1289_s14, %s1289_s14 }
  0x13   :  { %121 = vmatpush1.msra.mxu0 %v37_v4  ;;  %1396 = vmatpush1.msra.mxu1 %v37_v4  ;;  %v1597_v11 = vld [vmem:[#allocation2 + $0x160] sm:$0xff]  ;;  %v1599_v12 = vld [vmem:[#allocation2 + $0x148] sm:$0xff]  ;;  %v40_v51 = vld [vmem:[#allocation2 + $0x58] sm:$0xff] }
  0x14   :  { %122 = vmatprep.subr.mxu0 %v34_v5  ;;  %1393 = vmatprep.subr.mxu1 %v34_v5  ;;  %v1604_v13 = vld [vmem:[#allocation2 + $0x140] sm:$0xff]  ;;  %v1611_v14 = vld [vmem:[%s2006_s0 + $0x8] sm:$0xff]  ;;  %v39_v52 = vld [vmem:[#allocation2 + $0x50] sm:$0xff] }
  0x15   :  { %123 = vmatpush1.msra.mxu0 %v33_v6  ;;  %1397 = vmatpush1.msra.mxu1 %v33_v6  ;;  %v1613_v15 = vld [vmem:[#allocation2 + $0x128] sm:$0xff]  ;;  %v1616_v16 = vld [vmem:[#allocation2 + $0x120] sm:$0xff]  ;;  %v36_v54 = vld [vmem:[#allocation2 + $0x38] sm:$0xff] }
  0x16   :  { %124 = vmatprep.subr.mxu0 %v30_v7  ;;  %1394 = vmatprep.subr.mxu1 %v30_v7  ;;  %v1619_v17 = vld [vmem:[#allocation2 + $0x108] sm:$0xff]  ;;  %v1624_v18 = vld [vmem:[#allocation2 + $0x100] sm:$0xff]  ;;  %v35_v55 = vld [vmem:[#allocation2 + $0x30] sm:$0xff] }
  0x17   :  { %125 = vmatpush1.msra.mxu0 %v29_v8  ;;  %1398 = vmatpush1.msra.mxu1 %v29_v8  ;;  %v1633_v20 = vld [vmem:[#allocation2 + $0xe8] sm:$0xff]  ;;  %v1636_v21 = vld [vmem:[#allocation2 + $0xe0] sm:$0xff]  ;;  %v32_v56 = vld [vmem:[#allocation2 + $0x18] sm:$0xff] }
  0x18   :  { %1297 = vmatmul.mubr.msk.f32.vlgmr.msra.gmra.mxu0 %vm69_vm0, %v1593_v9  ;;  %326 = vmatprep.subr.mxu0 %v1595_v10  ;;  %v1639_v22 = vld [vmem:[#allocation2 + $0xc8] sm:$0xff]  ;;  %v1644_v23 = vld [vmem:[#allocation2 + $0xc0] sm:$0xff]  ;;  %v31_v57 = vld [vmem:[#allocation2 + $0x10] sm:$0xff] }
  0x19   :  { %327 = vmatpush1.msra.mxu0 %v1597_v11  ;;  %164 = vmatprep.mubr.f32.mxu0 %v1561_v0  ;;  %v1653_v25 = vld [vmem:[#allocation2 + $0xa8] sm:$0xff]  ;;  %v1656_v26 = vld [vmem:[#allocation2 + $0xa0] sm:$0xff]  ;;  %v67_v58 = vld [vmem:[%s2006_s0 + $0x30] sm:$0xff] }
  0x1a   :  { %328 = vmatprep.subr.mxu0 %v1599_v12  ;;  %v1659_v27 = vld [vmem:[#allocation2 + $0x88] sm:$0xff]  ;;  %v1664_v28 = vld [vmem:[#allocation2 + $0x80] sm:$0xff]  ;;  %231 = vmatprep.subr.mxu1 %v44_v49  ;;  %v68_v59 = vld [vmem:[%s2006_s0 + $0x38] sm:$0xff] }
  0x1b   :  { %329 = vmatpush1.msra.mxu0 %v1604_v13  ;;  %v65_v48 = vld [vmem:[%s2006_s0 + $0x20] sm:$0xff]  ;;  %v66_v53 = vld [vmem:[%s2006_s0 + $0x28] sm:$0xff] }
  0x1c   :  { %1298 = vmatmul.mubr.msk.f32.gmra.mxu0 %vm69_vm0, %v1611_v14  ;;  %330 = vmatprep.subr.mxu0 %v1613_v15 }
  0x1d   :  { %331 = vmatpush1.msra.mxu0 %v1616_v16  ;;  %170 = vmatprep.mubr.f32.mxu0 %v1561_v0 }
  0x1e   :  { %332 = vmatprep.subr.mxu0 %v1619_v17  ;;  %1301 = vmatmul.mubr.msk.f32.vlgmr.msra.gmra.mxu1 %vm69_vm0, %v65_v48 }
  0x1f   :  { %333 = vmatpush1.msra.mxu0 %v1624_v18  ;;  %232 = vmatpush1.msra.mxu1 %v43_v50 }
  0x20   :  { %1299 = vmatmul.mubr.msk.f32.gmra.mxu0 %vm69_vm0, %v1631_v19  ;;  %334 = vmatprep.subr.mxu0 %v1633_v20 }
  0x21   :  { %335 = vmatpush1.msra.mxu0 %v1636_v21  ;;  %176 = vmatprep.mubr.f32.mxu0 %v1561_v0 }
  0x22   :  { %336 = vmatprep.subr.mxu0 %v1639_v22  ;;  %188 = vmatprep.mubr.f32.mxu1 %v1561_v0 }
  0x23   :  { %337 = vmatpush1.msra.mxu0 %v1644_v23  ;;  %233 = vmatprep.subr.mxu1 %v40_v51 }
  0x24   :  { %1300 = vmatmul.mubr.msk.f32.gmra.mxu0 %vm69_vm0, %v1651_v24  ;;  %338 = vmatprep.subr.mxu0 %v1653_v25 }
  0x25   :  { %339 = vmatpush1.msra.mxu0 %v1656_v26  ;;  %374 = vmatprep.mubr.f32.mxu0 %v1561_v0 }
  0x26   :  { %340 = vmatprep.subr.mxu0 %v1659_v27  ;;  %234 = vmatpush1.msra.mxu1 %v39_v52 }
  0x27   :  { %341 = vmatpush1.msra.mxu0 %v1664_v28  ;;  %1302 = vmatmul.mubr.msk.f32.gmra.mxu1 %vm69_vm0, %v66_v53 }
  0x28   :  { %375 = vmatmul.mubr.f32.vlgmr.msra.gmra.mxu0 %v1561_v0  ;;  %538 = vmatprep.subr.mxu0 %v1595_v10 }
  0x29   :  { %539 = vmatpush1.msra.mxu0 %v1597_v11  ;;  %586 = vmatprep.mubr.f32.mxu0 %v1561_v0 }
  0x2a   :  { %540 = vmatprep.subr.mxu0 %v1599_v12  ;;  %235 = vmatprep.subr.mxu1 %v36_v54 }
  0x2b   :  { %541 = vmatpush1.msra.mxu0 %v1604_v13  ;;  %194 = vmatprep.mubr.f32.mxu1 %v1561_v0 }
  0x2c   :  { %542 = vmatprep.subr.mxu0 %v1613_v15  ;;  %236 = vmatpush1.msra.mxu1 %v35_v55 }
  0x2d   :  { %543 = vmatpush1.msra.mxu0 %v1616_v16  ;;  %237 = vmatprep.subr.mxu1 %v32_v56 }
  0x2e   :  { %544 = vmatprep.subr.mxu0 %v1619_v17  ;;  %238 = vmatpush1.msra.mxu1 %v31_v57 }
  0x2f   :  { %545 = vmatpush1.msra.mxu0 %v1624_v18  ;;  %1303 = vmatmul.mubr.msk.f32.gmra.mxu1 %vm69_vm0, %v67_v58 }
  0x30   :  { %546 = vmatprep.subr.mxu0 %v1633_v20  ;;  %432 = vmatprep.subr.mxu1 %v1595_v10 }
  0x31   :  { %547 = vmatpush1.msra.mxu0 %v1636_v21  ;;  %200 = vmatprep.mubr.f32.mxu1 %v1561_v0 }
  0x32   :  { %548 = vmatprep.subr.mxu0 %v1639_v22 }
  0x33   :  { %549 = vmatpush1.msra.mxu0 %v1644_v23  ;;  %1304 = vmatmul.mubr.msk.f32.gmra.mxu1 %vm69_vm0, %v68_v59 }
  0x34   :  { %550 = vmatprep.subr.mxu0 %v1653_v25  ;;  %271 = vmatprep.mubr.f32.mxu1 %v1561_v0 }
  0x35   :  { %551 = vmatpush1.msra.mxu0 %v1656_v26 }
  0x36   :  { %552 = vmatprep.subr.mxu0 %v1659_v27 }
  0x37   :  { %553 = vmatpush1.msra.mxu0 %v1664_v28  ;;  %1305 = vmatmul.mubr.msk.f32.vlgmr.msra.gmra.mxu1 %vm69_vm0, %v1593_v9 }
  0x38   :  { %750 = vmatprep.subr.mxu0 %v1595_v10  ;;  %433 = vmatpush1.msra.mxu1 %v1597_v11 }
  0x39   :  { %275 = vmatprep.mubr.f32.mxu1 %v1561_v0  ;;  %434 = vmatprep.subr.mxu1 %v1599_v12 }
  0x3a   :  { %435 = vmatpush1.msra.mxu1 %v1604_v13 }
  0x3b   :  { %1306 = vmatmul.mubr.msk.f32.gmra.mxu1 %vm69_vm0, %v1611_v14  ;;  %436 = vmatprep.subr.mxu1 %v1613_v15 }
  0x3c   :  { %279 = vmatprep.mubr.f32.mxu1 %v1561_v0  ;;  %437 = vmatpush1.msra.mxu1 %v1616_v16 }
  0x3d   :  { %438 = vmatprep.subr.mxu1 %v1619_v17 }
  0x3e   :  { %439 = vmatpush1.msra.mxu1 %v1624_v18 }
  0x3f   :  { %1307 = vmatmul.mubr.msk.f32.gmra.mxu1 %vm69_vm0, %v1631_v19  ;;  %440 = vmatprep.subr.mxu1 %v1633_v20 }
  0x40   :  { %283 = vmatprep.mubr.f32.mxu1 %v1561_v0  ;;  %441 = vmatpush1.msra.mxu1 %v1636_v21 }
  0x41   :  { %442 = vmatprep.subr.mxu1 %v1639_v22 }
  0x42   :  { %443 = vmatpush1.msra.mxu1 %v1644_v23 }
  0x43   :  { %1308 = vmatmul.mubr.msk.f32.gmra.mxu1 %vm69_vm0, %v1651_v24  ;;  %444 = vmatprep.subr.mxu1 %v1653_v25 }
  0x44   :  { %287 = vmatprep.mubr.f32.mxu1 %v1561_v0  ;;  %445 = vmatpush1.msra.mxu1 %v1656_v26 }
  0x45   :  { %446 = vmatprep.subr.mxu1 %v1659_v27 }
  0x46   :  { %447 = vmatpush1.msra.mxu1 %v1664_v28 }
  0x47   :  { %1309 = vmatmul.mubr.msk.f32.gmra.mxu1 %vm69_vm0, %v65_v48  ;;  %644 = vmatprep.subr.mxu1 %v1595_v10 }
  0x48   :  { %291 = vmatprep.mubr.f32.mxu1 %v1561_v0 }
  0x4b   :  { %1310 = vmatmul.mubr.msk.f32.gmra.mxu1 %vm69_vm0, %v66_v53 }
  0x4c   :  { %295 = vmatprep.mubr.f32.mxu1 %v1561_v0 }
  0x4f   :  { %1311 = vmatmul.mubr.msk.f32.gmra.mxu1 %vm69_vm0, %v67_v58 }
  0x50   :  { %299 = vmatprep.mubr.f32.mxu1 %v1561_v0 }
  0x53   :  { %1312 = vmatmul.mubr.msk.f32.gmra.mxu1 %vm69_vm0, %v68_v59 }
  0x54   :  { %480 = vmatprep.mubr.f32.mxu1 %v1561_v0 }
  0xd8   :  { %v160_v29 = vpop.f32.mrf.mxu0 }
  0xda   :  { %v162_v30 = vpop.f32.mrf.mxu0 }
  0xdc   :  { %v1689_v31 = vpop.f32.mrf.mxu0 }
  0xde   :  { %v1691_v32 = vpop.f32.mrf.mxu0  ;;  %v1771_v1 = vpop.f32.mrf.mxu1 }
  0xe0   :  { %v1693_v33 = vpop.f32.mrf.mxu0  ;;  %v1773_v2 = vpop.f32.mrf.mxu1 }
  0xe2   :  { %v1695_v34 = vpop.f32.mrf.mxu0 }
  0xe4   :  { %v1697_v35 = vpop.f32.mrf.mxu0 }
  0xe6   :  { %v1699_v36 = vpop.f32.mrf.mxu0 }
  0xe7   :  { %v1775_v3 = vpop.f32.mrf.mxu1 }
  0xe8   :  { %v376_v37 = vpop.f32.mrf.mxu0 }
  0xe9   :  { %v381_v38 = vadd.f32 %v376_v37, %v160_v29  ;;  %v1777_v4 = vpop.f32.mrf.mxu1 }
  0xea   :  { %v378_v39 = vpop.f32.mrf.mxu0 }
  0xeb   :  { %v1701_v40 = vadd.f32 %v378_v39, %v162_v30  ;;  %v1313_v42 = vmul.f32 -1.442695, %v381_v38 }
  0xed   :  { %1406 = vtanh.f32 %v1701_v40  ;;  %v1314_v7 = vmul.f32 -1.442695, %v1701_v40 }
  0xee   :  { %1408 = vpow2.f32 %v1313_v42 }
  0xef   :  { %v1779_v5 = vpop.f32.mrf.mxu1 }
  0xf1   :  { %v1781_v6 = vpop.f32.mrf.mxu1 }
  0xf3   :  { %v1784_v8 = vpop.f32.mrf.mxu1 }
  0xf5   :  { %v1786_v9 = vpop.f32.mrf.mxu1 }
  0xf7   :  { %v273_v14 = vpop.f32.mrf.mxu1 }
  0xf9   :  { %v274_v19 = vpop.f32.mrf.mxu1 }
  0xfa   :  { %v1407_v41 = vpop.eup %1406 }
  0xfb   :  { %398 = vrot.lane.b32.xlu0 %v1407_v41, %s1562_s26  ;;  %v1409_v43 = vpop.eup %1408  ;;  %v277_v24 = vpop.f32.mrf.mxu1 }
  0xfc   :  { %v389_v44 = vadd.f32 1.0, %v1409_v43 }
  0xfd   :  { %v278_v29 = vpop.f32.mrf.mxu1 }
  0xfe   :  { %1410 = vrcp.f32 %v389_v44 }
  0xff   :  { %v281_v30 = vpop.f32.mrf.mxu1 }
 0x101   :  { %v282_v37 = vpop.f32.mrf.mxu1 }
 0x103   :  { %v285_v38 = vpop.f32.mrf.mxu1 }
 0x105   :  { %v286_v41 = vpop.f32.mrf.mxu1 }
 0x107   :  { %v289_v43 = vpop.f32.mrf.mxu1 }
 0x109   :  { %v290_v44 = vpop.f32.mrf.mxu1 }
 0x10b   :  { %v1705_v45 = vpop.eup %1410 }
 0x10c   :  { %v396_v60 = vmul.f32 0.0, %v1705_v45 }
 0x16d   :  { %v399_v46 = vpop.permute.xlu0 %398 }
 0x16e   :  { %v401_v47 = vmul.f32 %v1705_v45, %v399_v46  ;;  %v293_v45 = vpop.f32.mrf.mxu1 }
 0x170   :  { %403 = vrot.lane.b32.xlu0 %v401_v47, %s1562_s26  ;;  %v294_v40 = vpop.f32.mrf.mxu1 }
 0x172   :  { %v297_v46 = vpop.f32.mrf.mxu1 }
 0x174   :  { %v298_v47 = vpop.f32.mrf.mxu1 }
 0x176   :  { %v1806_v51 = vpop.f32.mrf.mxu1 }
 0x178   :  { %v1808_v52 = vpop.f32.mrf.mxu1 }
 0x1e2   :  { %v404_v61 = vpop.permute.xlu0 %403 }
 0x1e3   :  { %v1767_v62 = vadd.f32 %v404_v61, %v396_v60 }
 0x1e5   :  { %1412 = vtanh.f32 %v1767_v62 }
 0x1e6   :  { %1414 = vpow2.f32 %v1314_v7 }
 0x1f2   :  { %v1413_v63 = vpop.eup %1412 }
 0x1f3   :  { %409 = vrot.lane.b32.xlu1 %v1413_v63, %s1562_s26  ;;  %v1415_v39 = vpop.eup %1414 }
 0x1f4   :  { %v390_v42 = vadd.f32 1.0, %v1415_v39 }
 0x1f6   :  { %1416 = vrcp.f32 %v390_v42 }
 0x203   :  { %v1417_v48 = vpop.eup %1416 }
 0x265   :  { %v410_v49 = vpop.permute.xlu1 %409 }
 0x266   :  { %v412_v50 = vmul.f32 %v1417_v48, %v410_v49 }
 0x268   :  { %1315 = vmatmul.mubr.msk.f32.vlgmr.msra.gmra.mxu1 %vm306_vm1, %v412_v50 }
 0x269   :  { %645 = vmatpush1.msra.mxu1 %v1597_v11  ;;  %692 = vmatprep.mubr.f32.mxu1 %v1561_v0 }
 0x26a   :  { %646 = vmatprep.subr.mxu1 %v1599_v12 }
 0x26b   :  { %647 = vmatpush1.msra.mxu1 %v1604_v13 }
 0x26c   :  { %648 = vmatprep.subr.mxu1 %v1613_v15 }
 0x26d   :  { %649 = vmatpush1.msra.mxu1 %v1616_v16 }
 0x26e   :  { %650 = vmatprep.subr.mxu1 %v1619_v17 }
 0x26f   :  { %651 = vmatpush1.msra.mxu1 %v1624_v18 }
 0x270   :  { %652 = vmatprep.subr.mxu1 %v1633_v20 }
 0x271   :  { %653 = vmatpush1.msra.mxu1 %v1636_v21 }
 0x272   :  { %654 = vmatprep.subr.mxu1 %v1639_v22 }
 0x273   :  { %655 = vmatpush1.msra.mxu1 %v1644_v23 }
 0x274   :  { %656 = vmatprep.subr.mxu1 %v1653_v25 }
 0x275   :  { %657 = vmatpush1.msra.mxu1 %v1656_v26 }
 0x276   :  { %658 = vmatprep.subr.mxu1 %v1659_v27 }
 0x277   :  { %659 = vmatpush1.msra.mxu1 %v1664_v28 }
 0x278   :  { %856 = vmatprep.subr.mxu1 %v1595_v10 }
 0x328   :  { %v482_v53 = vpop.f32.mrf.mxu1 }
 0x329   :  { %v487_v57 = vadd.f32 %v482_v53, %v1689_v31 }
 0x32a   :  { %v484_v54 = vpop.f32.mrf.mxu1 }
 0x32b   :  { %v488_v55 = vadd.f32 %v484_v54, %v1691_v32  ;;  %v1316_v58 = vmul.f32 -1.442695, %v487_v57 }
 0x32d   :  { %1418 = vtanh.f32 %v488_v55  ;;  %v1317_v29 = vmul.f32 -1.442695, %v488_v55 }
 0x32e   :  { %1420 = vpow2.f32 %v1316_v58 }
 0x33a   :  { %v1419_v56 = vpop.eup %1418 }
 0x33b   :  { %504 = vrot.lane.b32.xlu1 %v1419_v56, %s1562_s26  ;;  %v1421_v59 = vpop.eup %1420 }
 0x33c   :  { %v495_v60 = vadd.f32 1.0, %v1421_v59 }
 0x33e   :  { %1422 = vrcp.f32 %v495_v60 }
 0x34b   :  { %v1423_v61 = vpop.eup %1422 }
 0x34c   :  { %v502_v14 = vmul.f32 %v1423_v61, %v1767_v62 }
 0x3ad   :  { %v505_v63 = vpop.permute.xlu1 %504 }
 0x3ae   :  { %v507_v7 = vmul.f32 %v1423_v61, %v505_v63 }
 0x3b0   :  { %509 = vrot.lane.b32.xlu0 %v507_v7, %s1562_s26 }
 0x422   :  { %v510_v19 = vpop.permute.xlu0 %509 }
 0x423   :  { %v512_v32 = vadd.f32 %v510_v19, %v502_v14 }
 0x425   :  { %1424 = vtanh.f32 %v512_v32 }
 0x426   :  { %1426 = vpow2.f32 %v1317_v29 }
 0x432   :  { %v1425_v24 = vpop.eup %1424 }
 0x433   :  { %515 = vrot.lane.b32.xlu1 %v1425_v24, %s1562_s26  ;;  %v1427_v31 = vpop.eup %1426 }
 0x434   :  { %v496_v30 = vadd.f32 1.0, %v1427_v31 }
 0x436   :  { %1428 = vrcp.f32 %v496_v30 }
 0x443   :  { %v1429_v37 = vpop.eup %1428 }
 0x4a5   :  { %v516_v38 = vpop.permute.xlu1 %515 }
 0x4a6   :  { %v518_v39 = vmul.f32 %v1429_v37, %v516_v38 }
 0x4a8   :  { %1318 = vmatmul.mubr.msk.f32.vlgmr.msra.gmra.mxu0 %vm306_vm1, %v518_v39 }
 0x4a9   :  { %751 = vmatpush1.msra.mxu0 %v1597_v11  ;;  %798 = vmatprep.mubr.f32.mxu0 %v1561_v0 }
 0x4aa   :  { %752 = vmatprep.subr.mxu0 %v1599_v12 }
 0x4ab   :  { %753 = vmatpush1.msra.mxu0 %v1604_v13 }
 0x4ac   :  { %754 = vmatprep.subr.mxu0 %v1613_v15 }
 0x4ad   :  { %755 = vmatpush1.msra.mxu0 %v1616_v16 }
 0x4ae   :  { %756 = vmatprep.subr.mxu0 %v1619_v17 }
 0x4af   :  { %757 = vmatpush1.msra.mxu0 %v1624_v18 }
 0x4b0   :  { %758 = vmatprep.subr.mxu0 %v1633_v20 }
 0x4b1   :  { %759 = vmatpush1.msra.mxu0 %v1636_v21 }
 0x4b2   :  { %760 = vmatprep.subr.mxu0 %v1639_v22 }
 0x4b3   :  { %761 = vmatpush1.msra.mxu0 %v1644_v23 }
 0x4b4   :  { %762 = vmatprep.subr.mxu0 %v1653_v25 }
 0x4b5   :  { %763 = vmatpush1.msra.mxu0 %v1656_v26 }
 0x4b6   :  { %764 = vmatprep.subr.mxu0 %v1659_v27 }
 0x4b7   :  { %765 = vmatpush1.msra.mxu0 %v1664_v28 }
 0x4b8   :  { %962 = vmatprep.subr.mxu0 %v1595_v10 }
 0x568   :  { %v588_v62 = vpop.f32.mrf.mxu0 }
 0x569   :  { %v593_v44 = vadd.f32 %v588_v62, %v1693_v33 }
 0x56a   :  { %v590_v41 = vpop.f32.mrf.mxu0 }
 0x56b   :  { %v594_v42 = vadd.f32 %v590_v41, %v1695_v34  ;;  %v1319_v45 = vmul.f32 -1.442695, %v593_v44 }
 0x56d   :  { %1430 = vtanh.f32 %v594_v42  ;;  %v1320_v55 = vmul.f32 -1.442695, %v594_v42 }
 0x56e   :  { %1432 = vpow2.f32 %v1319_v45 }
 0x57a   :  { %v1431_v43 = vpop.eup %1430 }
 0x57b   :  { %610 = vrot.lane.b32.xlu0 %v1431_v43, %s1562_s26  ;;  %v1433_v40 = vpop.eup %1432 }
 0x57c   :  { %v601_v46 = vadd.f32 1.0, %v1433_v40 }
 0x57e   :  { %1434 = vrcp.f32 %v601_v46 }
 0x58b   :  { %v1435_v47 = vpop.eup %1434 }
 0x58c   :  { %v608_v50 = vmul.f32 %v1435_v47, %v512_v32 }
 0x5ed   :  { %v611_v48 = vpop.permute.xlu0 %610 }
 0x5ee   :  { %v613_v49 = vmul.f32 %v1435_v47, %v611_v48 }
 0x5f0   :  { %615 = vrot.lane.b32.xlu1 %v613_v49, %s1562_s26 }
 0x662   :  { %v616_v53 = vpop.permute.xlu1 %615 }
 0x663   :  { %v618_v54 = vadd.f32 %v616_v53, %v608_v50 }
 0x665   :  { %1436 = vtanh.f32 %v618_v54 }
 0x666   :  { %1438 = vpow2.f32 %v1320_v55 }
 0x672   :  { %v1437_v34 = vpop.eup %1436 }
 0x673   :  { %621 = vrot.lane.b32.xlu0 %v1437_v34, %s1562_s26  ;;  %v1439_v33 = vpop.eup %1438 }
 0x674   :  { %v602_v56 = vadd.f32 1.0, %v1439_v33 }
 0x676   :  { %1440 = vrcp.f32 %v602_v56 }
 0x683   :  { %v1441_v57 = vpop.eup %1440 }
 0x6e5   :  { %v622_v58 = vpop.permute.xlu0 %621 }
 0x6e6   :  { %v624_v59 = vmul.f32 %v1441_v57, %v622_v58 }
 0x6e8   :  { %1321 = vmatmul.mubr.msk.f32.vlgmr.msra.gmra.mxu1 %vm306_vm1, %v624_v59 }
 0x6e9   :  { %857 = vmatpush1.msra.mxu1 %v1597_v11  ;;  %904 = vmatprep.mubr.f32.mxu1 %v1561_v0 }
 0x6ea   :  { %858 = vmatprep.subr.mxu1 %v1599_v12 }
 0x6eb   :  { %859 = vmatpush1.msra.mxu1 %v1604_v13 }
 0x6ec   :  { %860 = vmatprep.subr.mxu1 %v1613_v15 }
 0x6ed   :  { %861 = vmatpush1.msra.mxu1 %v1616_v16 }
 0x6ee   :  { %862 = vmatprep.subr.mxu1 %v1619_v17 }
 0x6ef   :  { %863 = vmatpush1.msra.mxu1 %v1624_v18 }
 0x6f0   :  { %864 = vmatprep.subr.mxu1 %v1633_v20 }
 0x6f1   :  { %865 = vmatpush1.msra.mxu1 %v1636_v21 }
 0x6f2   :  { %866 = vmatprep.subr.mxu1 %v1639_v22 }
 0x6f3   :  { %867 = vmatpush1.msra.mxu1 %v1644_v23 }
 0x6f4   :  { %868 = vmatprep.subr.mxu1 %v1653_v25 }
 0x6f5   :  { %869 = vmatpush1.msra.mxu1 %v1656_v26 }
 0x6f6   :  { %870 = vmatprep.subr.mxu1 %v1659_v27 }
 0x6f7   :  { %871 = vmatpush1.msra.mxu1 %v1664_v28 }
 0x6f8   :  { %1068 = vmatprep.subr.mxu1 %v1595_v10 }
 0x7a8   :  { %v694_v60 = vpop.f32.mrf.mxu1 }
 0x7a9   :  { %v699_v14 = vadd.f32 %v694_v60, %v1697_v35 }
 0x7aa   :  { %v696_v61 = vpop.f32.mrf.mxu1 }
 0x7ab   :  { %v700_v63 = vadd.f32 %v696_v61, %v1699_v36  ;;  %v1322_v19 = vmul.f32 -1.442695, %v699_v14 }
 0x7ad   :  { %1442 = vtanh.f32 %v700_v63  ;;  %v1323_v39 = vmul.f32 -1.442695, %v700_v63 }
 0x7ae   :  { %1444 = vpow2.f32 %v1322_v19 }
 0x7ba   :  { %v1443_v7 = vpop.eup %1442 }
 0x7bb   :  { %716 = vrot.lane.b32.xlu1 %v1443_v7, %s1562_s26  ;;  %v1445_v32 = vpop.eup %1444 }
 0x7bc   :  { %v707_v24 = vadd.f32 1.0, %v1445_v32 }
 0x7be   :  { %1446 = vrcp.f32 %v707_v24 }
 0x7cb   :  { %v1447_v29 = vpop.eup %1446 }
 0x7cc   :  { %v714_v10 = vmul.f32 %v1447_v29, %v618_v54 }
 0x82d   :  { %v717_v31 = vpop.permute.xlu1 %716 }
 0x82e   :  { %v719_v30 = vmul.f32 %v1447_v29, %v717_v31 }
 0x830   :  { %721 = vrot.lane.b32.xlu0 %v719_v30, %s1562_s26 }
 0x8a2   :  { %v722_v37 = vpop.permute.xlu0 %721 }
 0x8a3   :  { %v724_v38 = vadd.f32 %v722_v37, %v714_v10 }
 0x8a5   :  { %1448 = vtanh.f32 %v724_v38 }
 0x8a6   :  { %1450 = vpow2.f32 %v1323_v39 }
 0x8b2   :  { %v1449_v36 = vpop.eup %1448 }
 0x8b3   :  { %727 = vrot.lane.b32.xlu1 %v1449_v36, %s1562_s26  ;;  %v1451_v35 = vpop.eup %1450 }
 0x8b4   :  { %v708_v62 = vadd.f32 1.0, %v1451_v35 }
 0x8b6   :  { %1452 = vrcp.f32 %v708_v62 }
 0x8c3   :  { %v1453_v41 = vpop.eup %1452 }
 0x925   :  { %v728_v42 = vpop.permute.xlu1 %727 }
 0x926   :  { %v730_v43 = vmul.f32 %v1453_v41, %v728_v42 }
 0x928   :  { %1324 = vmatmul.mubr.msk.f32.vlgmr.msra.gmra.mxu0 %vm306_vm1, %v730_v43 }
 0x929   :  { %963 = vmatpush1.msra.mxu0 %v1597_v11  ;;  %1010 = vmatprep.mubr.f32.mxu0 %v1561_v0 }
 0x92a   :  { %964 = vmatprep.subr.mxu0 %v1599_v12 }
 0x92b   :  { %965 = vmatpush1.msra.mxu0 %v1604_v13 }
 0x92c   :  { %966 = vmatprep.subr.mxu0 %v1613_v15 }
 0x92d   :  { %967 = vmatpush1.msra.mxu0 %v1616_v16 }
 0x92e   :  { %968 = vmatprep.subr.mxu0 %v1619_v17 }
 0x92f   :  { %969 = vmatpush1.msra.mxu0 %v1624_v18 }
 0x930   :  { %970 = vmatprep.subr.mxu0 %v1633_v20 }
 0x931   :  { %971 = vmatpush1.msra.mxu0 %v1636_v21 }
 0x932   :  { %972 = vmatprep.subr.mxu0 %v1639_v22 }
 0x933   :  { %973 = vmatpush1.msra.mxu0 %v1644_v23 }
 0x934   :  { %974 = vmatprep.subr.mxu0 %v1653_v25 }
 0x935   :  { %975 = vmatpush1.msra.mxu0 %v1656_v26 }
 0x936   :  { %976 = vmatprep.subr.mxu0 %v1659_v27 }
 0x937   :  { %977 = vmatpush1.msra.mxu0 %v1664_v28 }
 0x938   :  { %1356 = vmatprep.subr.mxu0 %v1561_v0 }
 0x9e8   :  { %v800_v44 = vpop.f32.mrf.mxu0 }
 0x9e9   :  { %v805_v47 = vadd.f32 %v800_v44, %v1771_v1 }
 0x9ea   :  { %v802_v45 = vpop.f32.mrf.mxu0 }
 0x9eb   :  { %v806_v40 = vadd.f32 %v802_v45, %v1773_v2  ;;  %v1325_v48 = vmul.f32 -1.442695, %v805_v47 }
 0x9ed   :  { %1454 = vtanh.f32 %v806_v40  ;;  %v1326_v57 = vmul.f32 -1.442695, %v806_v40 }
 0x9ee   :  { %1456 = vpow2.f32 %v1325_v48 }
 0x9fa   :  { %v1455_v46 = vpop.eup %1454 }
 0x9fb   :  { %822 = vrot.lane.b32.xlu0 %v1455_v46, %s1562_s26  ;;  %v1457_v49 = vpop.eup %1456 }
 0x9fc   :  { %v813_v50 = vadd.f32 1.0, %v1457_v49 }
 0x9fe   :  { %1458 = vrcp.f32 %v813_v50 }
 0xa0b   :  { %v1459_v53 = vpop.eup %1458 }
 0xa0c   :  { %v820_v55 = vmul.f32 %v1459_v53, %v724_v38 }
 0xa6d   :  { %v823_v54 = vpop.permute.xlu0 %822 }
 0xa6e   :  { %v825_v34 = vmul.f32 %v1459_v53, %v823_v54 }
 0xa70   :  { %827 = vrot.lane.b32.xlu1 %v825_v34, %s1562_s26 }
 0xae2   :  { %v828_v33 = vpop.permute.xlu1 %827 }
 0xae3   :  { %v830_v56 = vadd.f32 %v828_v33, %v820_v55 }
 0xae5   :  { %1460 = vtanh.f32 %v830_v56 }
 0xae6   :  { %1462 = vpow2.f32 %v1326_v57 }
 0xaf2   :  { %v1461_v2 = vpop.eup %1460 }
 0xaf3   :  { %833 = vrot.lane.b32.xlu0 %v1461_v2, %s1562_s26  ;;  %v1463_v1 = vpop.eup %1462  ;;  %v1337_v2 = vmul.f32 -1.442695, %v1808_v52 }
 0xaf4   :  { %v814_v58 = vadd.f32 1.0, %v1463_v1 }
 0xaf6   :  { %1464 = vrcp.f32 %v814_v58 }
 0xb03   :  { %v1465_v59 = vpop.eup %1464 }
 0xb65   :  { %v834_v60 = vpop.permute.xlu0 %833 }
 0xb66   :  { %v836_v61 = vmul.f32 %v1465_v59, %v834_v60 }
 0xb68   :  { %1327 = vmatmul.mubr.msk.f32.vlgmr.msra.gmra.mxu1 %vm306_vm1, %v836_v61 }
 0xb69   :  { %1069 = vmatpush1.msra.mxu1 %v1597_v11  ;;  %1116 = vmatprep.mubr.f32.mxu1 %v1561_v0 }
 0xb6a   :  { %1070 = vmatprep.subr.mxu1 %v1599_v12 }
 0xb6b   :  { %1071 = vmatpush1.msra.mxu1 %v1604_v13 }
 0xb6c   :  { %1072 = vmatprep.subr.mxu1 %v1613_v15 }
 0xb6d   :  { %1073 = vmatpush1.msra.mxu1 %v1616_v16 }
 0xb6e   :  { %1074 = vmatprep.subr.mxu1 %v1619_v17 }
 0xb6f   :  { %1075 = vmatpush1.msra.mxu1 %v1624_v18 }
 0xb70   :  { %1076 = vmatprep.subr.mxu1 %v1633_v20 }
 0xb71   :  { %1077 = vmatpush1.msra.mxu1 %v1636_v21 }
 0xb72   :  { %1078 = vmatprep.subr.mxu1 %v1639_v22 }
 0xb73   :  { %1079 = vmatpush1.msra.mxu1 %v1644_v23 }
 0xb74   :  { %1080 = vmatprep.subr.mxu1 %v1653_v25 }
 0xb75   :  { %1081 = vmatpush1.msra.mxu1 %v1656_v26 }
 0xb76   :  { %1082 = vmatprep.subr.mxu1 %v1659_v27 }
 0xb77   :  { %1083 = vmatpush1.msra.mxu1 %v1664_v28 }
 0xc28   :  { %v906_v11 = vpop.f32.mrf.mxu1 }
 0xc29   :  { %v911_v16 = vadd.f32 %v906_v11, %v1775_v3 }
 0xc2a   :  { %v908_v12 = vpop.f32.mrf.mxu1 }
 0xc2b   :  { %v912_v13 = vadd.f32 %v908_v12, %v1777_v4  ;;  %v1328_v17 = vmul.f32 -1.442695, %v911_v16 }
 0xc2d   :  { %1466 = vtanh.f32 %v912_v13  ;;  %v1329_v4 = vmul.f32 -1.442695, %v912_v13 }
 0xc2e   :  { %1468 = vpow2.f32 %v1328_v17 }
 0xc3a   :  { %v1467_v15 = vpop.eup %1466 }
 0xc3b   :  { %928 = vrot.lane.b32.xlu1 %v1467_v15, %s1562_s26  ;;  %v1469_v18 = vpop.eup %1468 }
 0xc3c   :  { %v919_v20 = vadd.f32 1.0, %v1469_v18 }
 0xc3e   :  { %1470 = vrcp.f32 %v919_v20 }
 0xc4b   :  { %v1471_v21 = vpop.eup %1470 }
 0xc4c   :  { %v926_v25 = vmul.f32 %v1471_v21, %v830_v56 }
 0xcad   :  { %v929_v22 = vpop.permute.xlu1 %928 }
 0xcae   :  { %v931_v23 = vmul.f32 %v1471_v21, %v929_v22  ;;  %v1204_v22 = vld [vmem:[%s2008_s2 + $0x70] sm:$0xff] }
 0xcb0   :  { %933 = vrot.lane.b32.xlu0 %v931_v23, %s1562_s26  ;;  %v1202_v23 = vld [vmem:[%s2008_s2 + $0x60] sm:$0xff] }
 0xd22   :  { %v934_v26 = vpop.permute.xlu0 %933 }
 0xd23   :  { %v936_v27 = vadd.f32 %v934_v26, %v926_v25  ;;  %v1201_v25 = vld [vmem:[%s2008_s2 + $0x58] sm:$0xff]  ;;  %v1200_v26 = vld [vmem:[%s2008_s2 + $0x50] sm:$0xff] }
 0xd25   :  { %1472 = vtanh.f32 %v936_v27 }
 0xd26   :  { %1474 = vpow2.f32 %v1329_v4  ;;  %v1197_v4 = vld [vmem:[%s2008_s2 + $0x38] sm:$0xff] }
 0xd32   :  { %v1473_v28 = vpop.eup %1472 }
 0xd33   :  { %939 = vrot.lane.b32.xlu1 %v1473_v28, %s1562_s26  ;;  %v1475_v3 = vpop.eup %1474  ;;  %v1198_v28 = vld [vmem:[%s2008_s2 + $0x40] sm:$0xff] }
 0xd34   :  { %v920_v63 = vadd.f32 1.0, %v1475_v3  ;;  %v1196_v3 = vld [vmem:[%s2008_s2 + $0x30] sm:$0xff] }
 0xd36   :  { %1476 = vrcp.f32 %v920_v63  ;;  %v1195_v63 = vld [vmem:[%s2008_s2 + $0x28] sm:$0xff] }
 0xd43   :  { %v1477_v7 = vpop.eup %1476 }
 0xda5   :  { %v940_v14 = vpop.permute.xlu1 %939 }
 0xda6   :  { %v942_v19 = vmul.f32 %v1477_v7, %v940_v14  ;;  %v1194_v7 = vld [vmem:[%s2008_s2 + $0x20] sm:$0xff]  ;;  %v1193_v14 = vld [vmem:[%s2008_s2 + $0x18] sm:$0xff] }
 0xda8   :  { %1330 = vmatmul.mubr.msk.f32.vlgmr.msra.gmra.mxu0 %vm306_vm1, %v942_v19  ;;  %v1192_v19 = vld [vmem:[%s2008_s2 + $0x10] sm:$0xff] }
 0xda9   :  { %1388 = vmatprep.mubr.msk.f32.mxu0 %vm1563_vm2, %v1561_v0 }
 0xe68   :  { %v1012_v32 = vpop.f32.mrf.mxu0 }
 0xe69   :  { %v1017_v30 = vadd.f32 %v1012_v32, %v1779_v5 }
 0xe6a   :  { %v1014_v24 = vpop.f32.mrf.mxu0 }
 0xe6b   :  { %v1018_v29 = vadd.f32 %v1014_v24, %v1781_v6  ;;  %v1331_v10 = vmul.f32 -1.442695, %v1017_v30  ;;  %v1336_v6 = vmul.f32 -1.442695, %v1806_v51  ;;  %v1190_v30 = vld [vmem:[%s2008_s2] sm:$0xff] }
 0xe6d   :  { %1478 = vtanh.f32 %v1018_v29  ;;  %v1332_v48 = vmul.f32 -1.442695, %v1018_v29 }
 0xe6e   :  { %1480 = vpow2.f32 %v1331_v10 }
 0xe7a   :  { %v1479_v31 = vpop.eup %1478 }
 0xe7b   :  { %1034 = vrot.lane.b32.xlu0 %v1479_v31, %s1562_s26  ;;  %v1481_v37 = vpop.eup %1480  ;;  %v1191_v31 = vld [vmem:[%s2008_s2 + $0x8] sm:$0xff] }
 0xe7c   :  { %v1025_v38 = vadd.f32 1.0, %v1481_v37 }
 0xe7e   :  { %1482 = vrcp.f32 %v1025_v38 }
 0xe7f   :  { %1484 = vtanh.f32 %v1808_v52 }
 0xe80   :  { %1486 = vpow2.f32 %v1336_v6 }
 0xe8b   :  { %v1483_v36 = vpop.eup %1482 }
 0xe8c   :  { %v1485_v62 = vpop.eup %1484  ;;  %v1032_v42 = vmul.f32 %v1483_v36, %v936_v27  ;;  %v1199_v27 = vld [vmem:[%s2008_s2 + $0x48] sm:$0xff] }
 0xe8d   :  { %v1487_v41 = vpop.eup %1486 }
 0xe8e   :  { %v1161_v5 = vadd.f32 1.0, %v1487_v41 }
 0xe90   :  { %1488 = vrcp.f32 %v1161_v5 }
 0xe9d   :  { %v1489_v45 = vpop.eup %1488 }
 0xe9e   :  { %v1168_v50 = vmul.f32 0.0, %v1489_v45 }
 0xeed   :  { %v1035_v39 = vpop.permute.xlu0 %1034 }
 0xeee   :  { %v1037_v35 = vmul.f32 %v1483_v36, %v1035_v39 }
 0xef0   :  { %1039 = vrot.lane.b32.xlu1 %v1037_v35, %s1562_s26 }
 0xef4   :  { %1170 = vrot.lane.b32.xlu1 %v1485_v62, %s1562_s26 }
 0xf62   :  { %v1040_v43 = vpop.permute.xlu1 %1039 }
 0xf63   :  { %v1915_v44 = vadd.f32 %v1040_v43, %v1032_v42 }
 0xf65   :  { %1490 = vtanh.f32 %v1915_v44 }
 0xf66   :  { %v1171_v40 = vpop.permute.xlu1 %1170  ;;  %1492 = vpow2.f32 %v1332_v48 }
 0xf67   :  { %v1173_v46 = vmul.f32 %v1489_v45, %v1171_v40 }
 0xf69   :  { %1175 = vrot.lane.b32.xlu1 %v1173_v46, %s1562_s26 }
 0xf72   :  { %v1491_v47 = vpop.eup %1490 }
 0xf73   :  { %1045 = vrot.lane.b32.xlu0 %v1491_v47, %s1562_s26  ;;  %v1493_v51 = vpop.eup %1492 }
 0xf74   :  { %v1026_v49 = vadd.f32 1.0, %v1493_v51 }
 0xf76   :  { %1494 = vrcp.f32 %v1026_v49 }
 0xf83   :  { %v1495_v34 = vpop.eup %1494 }
 0xfdb   :  { %v1176_v53 = vpop.permute.xlu1 %1175 }
 0xfdc   :  { %v1178_v54 = vadd.f32 %v1176_v53, %v1168_v50 }
 0xfde   :  { %1496 = vtanh.f32 %v1178_v54 }
 0xfdf   :  { %1498 = vpow2.f32 %v1337_v2 }
 0xfe5   :  { %v1046_v55 = vpop.permute.xlu0 %1045 }
 0xfe6   :  { %v1048_v33 = vmul.f32 %v1495_v34, %v1046_v55 }
 0xfe8   :  { %1333 = vmatmul.mubr.msk.f32.vlgmr.msra.gmra.mxu1 %vm306_vm1, %v1048_v33 }
 0xfeb   :  { %v1497_v56 = vpop.eup %1496 }
 0xfec   :  { %1181 = vrot.lane.b32.xlu1 %v1497_v56, %s1562_s26  ;;  %v1499_v57 = vpop.eup %1498 }
 0xfed   :  { %v1162_v1 = vadd.f32 1.0, %v1499_v57 }
 0xfef   :  { %1500 = vrcp.f32 %v1162_v1 }
 0xffc   :  { %v1501_v58 = vpop.eup %1500 }
0x105e   :  { %v1182_v59 = vpop.permute.xlu1 %1181 }
0x105f   :  { %v1184_v60 = vmul.f32 %v1501_v58, %v1182_v59 }
0x1061   :  { %1186 = vrot.lane.b32.xlu1 %v1184_v60, %s1562_s26 }
0x10a8   :  { %v1118_v61 = vpop.f32.mrf.mxu1 }
0x10a9   :  { %v1123_v52 = vadd.f32 %v1118_v61, %v1784_v8  ;;  %v1203_v8 = vld [vmem:[%s2008_s2 + $0x68] sm:$0xff] }
0x10aa   :  { %v1120_v11 = vpop.f32.mrf.mxu1 }
0x10ab   :  { %v1925_v12 = vadd.f32 %v1120_v11, %v1786_v9  ;;  %v1334_v15 = vmul.f32 -1.442695, %v1123_v52  ;;  %v1205_v9 = vld [vmem:[%s2008_s2 + $0x78] sm:$0xff] }
0x10ac   :  { %1357 = vmatpush3.msra.mxu0 %v1205_v9 }
0x10ad   :  { %1502 = vtanh.f32 %v1925_v12  ;;  %1358 = vmatprep.subr.mxu0 %v1561_v0  ;;  %v1335_v37 = vmul.f32 -1.442695, %v1925_v12 }
0x10ae   :  { %1504 = vpow2.f32 %v1334_v15  ;;  %1359 = vmatpush3.msra.mxu0 %v1204_v22 }
0x10af   :  { %1360 = vmatprep.subr.mxu0 %v1561_v0 }
0x10b0   :  { %1361 = vmatpush3.msra.mxu0 %v1203_v8 }
0x10b1   :  { %1362 = vmatprep.subr.mxu0 %v1561_v0 }
0x10b2   :  { %1363 = vmatpush3.msra.mxu0 %v1202_v23 }
0x10b3   :  { %1364 = vmatprep.subr.mxu0 %v1561_v0 }
0x10b4   :  { %1365 = vmatpush3.msra.mxu0 %v1201_v25 }
0x10b5   :  { %1366 = vmatprep.subr.mxu0 %v1561_v0 }
0x10b6   :  { %1367 = vmatpush3.msra.mxu0 %v1200_v26 }
0x10b7   :  { %1368 = vmatprep.subr.mxu0 %v1561_v0 }
0x10b8   :  { %1369 = vmatpush3.msra.mxu0 %v1199_v27 }
0x10b9   :  { %1370 = vmatprep.subr.mxu0 %v1561_v0 }
0x10ba   :  { %v1503_v13 = vpop.eup %1502  ;;  %1371 = vmatpush3.msra.mxu0 %v1198_v28 }
0x10bb   :  { %1140 = vrot.lane.b32.xlu0 %v1503_v13, %s1562_s26  ;;  %v1505_v16 = vpop.eup %1504  ;;  %1372 = vmatprep.subr.mxu0 %v1561_v0 }
0x10bc   :  { %v1131_v17 = vadd.f32 1.0, %v1505_v16  ;;  %1373 = vmatpush3.msra.mxu0 %v1197_v4 }
0x10bd   :  { %1374 = vmatprep.subr.mxu0 %v1561_v0 }
0x10be   :  { %1506 = vrcp.f32 %v1131_v17  ;;  %1375 = vmatpush3.msra.mxu0 %v1196_v3 }
0x10bf   :  { %1376 = vmatprep.subr.mxu0 %v1561_v0 }
0x10c0   :  { %1377 = vmatpush3.msra.mxu0 %v1195_v63 }
0x10c1   :  { %1378 = vmatprep.subr.mxu0 %v1561_v0 }
0x10c2   :  { %1379 = vmatpush3.msra.mxu0 %v1194_v7 }
0x10c3   :  { %1380 = vmatprep.subr.mxu0 %v1561_v0 }
0x10c4   :  { %1381 = vmatpush3.msra.mxu0 %v1193_v14 }
0x10c5   :  { %1382 = vmatprep.subr.mxu0 %v1561_v0 }
0x10c6   :  { %1383 = vmatpush3.msra.mxu0 %v1192_v19 }
0x10c7   :  { %1384 = vmatprep.subr.mxu0 %v1561_v0 }
0x10c8   :  { %1385 = vmatpush3.msra.mxu0 %v1191_v31 }
0x10c9   :  { %1386 = vmatprep.subr.mxu0 %v1561_v0  ;;  %v1338_v0 = vld [vmem:[%s2008_s2 + $0x80] ss:$0 sm:$0xff] }
0x10ca   :  { %1387 = vmatpush3.msra.mxu0 %v1190_v30 }
0x10cb   :  { %v1507_v18 = vpop.eup %1506 }
0x10cc   :  { %v1138_v32 = vmul.f32 %v1507_v18, %v1915_v44 }
0x10d3   :  { %v1187_v6 = vpop.permute.xlu1 %1186 }
0x112d   :  { %v1141_v20 = vpop.permute.xlu0 %1140 }
0x112e   :  { %v1143_v21 = vmul.f32 %v1507_v18, %v1141_v20 }
0x1130   :  { %1145 = vrot.lane.b32.xlu0 %v1143_v21, %s1562_s26 }
0x11a2   :  { %v1146_v24 = vpop.permute.xlu0 %1145 }
0x11a3   :  { %v1148_v29 = vadd.f32 %v1146_v24, %v1138_v32 }
0x11a5   :  { %1508 = vtanh.f32 %v1148_v29 }
0x11a6   :  { %1510 = vpow2.f32 %v1335_v37 }
0x11b2   :  { %v1509_v10 = vpop.eup %1508 }
0x11b3   :  { %1151 = vrot.lane.b32.xlu0 %v1509_v10, %s1562_s26  ;;  %v1511_v38 = vpop.eup %1510  ;;  %s1534_s26 = scalar_lea.vmem %s1289_s14, 128 }
0x11b4   :  { %v1132_v36 = vadd.f32 1.0, %v1511_v38  ;;  %p1535_p5 = scmp.ne.s32.totalorder %s1289_s14, %s1534_s26  ;;  %p1540_p7 = scmp.lt.s32.totalorder %s1534_s26, %s1534_s26 }
0x11b6   :  { %1512 = vrcp.f32 %v1132_v36  ;;  %p1541_p8 = por %p1540_p7, %p1539_p6 }
0x11b8   :  { %p1542_p9 = pnand %p1541_p8, %p1535_p5 }
0x11c3   :  { %v1513_v39 = vpop.eup %1512 }
0x1225   :  { %v1152_v35 = vpop.permute.xlu0 %1151 }
0x1226   :  { %v1154_v62 = vmul.f32 %v1513_v39, %v1152_v35 }
0x1228   :  { %v1189_v41 = vsel %vm306_vm1, %v1154_v62, %v1187_v6 }
0x1229   :  { %1389 = vmatmul.mubr.f32.vlgmr.msra.gmra.mxu0 %v1189_v41 }
0x12e9   :  { %v1277_v5 = vpop.f32.mrf.mxu0 }
0x12ea   :  { %v1278_v42 = vadd.f32 %v1338_v0, %v1277_v5 }
0x12eb   :  { %v1390_v43 = vpop.f32.mrf.mxu0 }
0x12ec   :  { %1281 = vst.msk [vmem:[#allocation5] sm:$0xff] %vm69_vm0, %v1278_v42 }
0x12ed   :  { %1545 = shalt.err (!%p1542_p9)
}
0x12ee   :  { %1291 = dma.vmem_to_hbm [thread:$0]  %s1289_s14, 128, %s2009_s3, [#allocation4]  }
0x12ef   :  { %1556 = dma.done.wait [#allocation4], 128  }
0x12f0   :  { %1557 = vsyncadd [#allocation4], 4294967168 }
0x12f1   :  { %1295 = vsyncpa [#allocation3], 1 }
0x12f2   :  { %1296 = vsyncpa [#allocation4], 1 }

</bundles_post_ra>
